<compile_context>
chip_gen: v5e
topology: v5e:2x2
jax: 0.10.0
libtpu: 0.0.40
codegen_flags: <defaults>
</compile_context>

<pallas_src>
import jax
import jax.numpy as jnp
from jax.experimental import pallas as pl
from jax.experimental.pallas import tpu as pltpu

# ---------------- model hyper-parameters (small, consistent with the module) ----
BATCH = 8
INPUT_DIM = 32
HIDDEN_DIM = 32
OUTPUT_ROWS = 8
OUTPUT_COLS = 8
N_HIDDEN_LAYERS = 1
OUT_DIM = OUTPUT_ROWS * OUTPUT_COLS          # 64 (natural output width, full dim)
HID_PAD = 128                                # hidden width padded to a full lane group
DROPOUT_RATE = 0.0                           # identity in forward


def _mlp_cholesky_kernel(x_ref, w1_ref, wh_ref, w2_ref, bh_ref, b2_ref, out_ref):
    # x_ref : (tb, INPUT_DIM)
    # w1_ref: (INPUT_DIM, HID_PAD)
    # wh_ref: (L, HID_PAD, HID_PAD)
    # w2_ref: (HID_PAD, OUT_DIM)          -- triu mask folded in, rows zero-padded
    # bh_ref: (L + 1, 1, HID_PAD)         -- [b1 ; bh_0 .. bh_{L-1}], zero-padded
    # b2_ref: (1, OUT_DIM)                -- b2 * mask
    # out_ref: (tb, OUT_DIM)
    h = jnp.dot(x_ref[...], w1_ref[...], preferred_element_type=jnp.float32)
    h = jnp.maximum(h + bh_ref[0], 0.0)

    for l in range(N_HIDDEN_LAYERS):          # unrolled at trace time
        h = jnp.dot(h, wh_ref[l], preferred_element_type=jnp.float32)
        h = jnp.maximum(h + bh_ref[1 + l], 0.0)

    out = jnp.dot(h, w2_ref[...], preferred_element_type=jnp.float32)
    out_ref[...] = out + b2_ref[...]


def _round_up(v, m):
    return ((v + m - 1) // m) * m


def _pick_batch_tile(B, tile_b):
    if B <= 8:
        return B                 # one block covering the whole (tiny) batch; full-dim block is legal
    # Cap at ceil(B/2) (rounded to sublane granularity) so there are always >= 2
    # grid blocks -> the "parallel" axis shards across both v7x TensorCores.
    tb = min(tile_b, _round_up(pl.cdiv(B, 2), 8))
    return max(8, (tb // 8) * 8)


def cholesky_matrix_predictor(x, kernel_params, *, tile_b=2048):
    """Fused MLP + triangular-mask forward. Returns (B, R, C) float32."""
    w1p, whp, w2m, bias_h, b2m = kernel_params
    B = x.shape[0]
    tb = _pick_batch_tile(B, tile_b)
    n_blocks = pl.cdiv(B, tb)            # ragged last block handled by Pallas (no wrapper pad)

    L = N_HIDDEN_LAYERS
    flops = 2 * B * (INPUT_DIM * HID_PAD
                     + L * HID_PAD * HID_PAD
                     + HID_PAD * OUT_DIM)
    bytes_accessed = 4 * (x.size + w1p.size + whp.size + w2m.size
                          + bias_h.size + b2m.size + B * OUT_DIM)

    out = pl.pallas_call(
        _mlp_cholesky_kernel,
        out_shape=jax.ShapeDtypeStruct((B, OUT_DIM), jnp.float32),
        grid=(n_blocks,),
        in_specs=[
            pl.BlockSpec((tb, INPUT_DIM), lambda i: (i, 0)),
            pl.BlockSpec((INPUT_DIM, HID_PAD), lambda i: (0, 0)),
            pl.BlockSpec((L, HID_PAD, HID_PAD), lambda i: (0, 0, 0)),
            pl.BlockSpec((HID_PAD, OUT_DIM), lambda i: (0, 0)),
            pl.BlockSpec((L + 1, 1, HID_PAD), lambda i: (0, 0, 0)),
            pl.BlockSpec((1, OUT_DIM), lambda i: (0, 0)),
        ],
        out_specs=pl.BlockSpec((tb, OUT_DIM), lambda i: (i, 0)),
        compiler_params=pltpu.CompilerParams(
            dimension_semantics=("parallel",)),
        cost_estimate=pl.CostEstimate(
            flops=flops, transcendentals=0, bytes_accessed=bytes_accessed),
    )(x, w1p, whp, w2m, bias_h, b2m)

    # (B, 64) -> (B, R, C): contiguous reshape, metadata-only (no extra HBM pass).
    return out.reshape(B, OUTPUT_ROWS, OUTPUT_COLS)


def init_params(key, std=0.02):
    """Raw parameters (transposed-Linear layout: (in_features, out_features))."""
    k1, k2, k3, k4, k5, k6 = jax.random.split(key, 6)
    w1 = std * jax.random.normal(k1, (INPUT_DIM, HIDDEN_DIM), jnp.float32)
    b1 = std * jax.random.normal(k4, (1, HIDDEN_DIM), jnp.float32)
    wh = std * jax.random.normal(k2, (N_HIDDEN_LAYERS, HIDDEN_DIM, HIDDEN_DIM),
                                 jnp.float32)
    bh = std * jax.random.normal(k5, (N_HIDDEN_LAYERS, 1, HIDDEN_DIM), jnp.float32)
    w2 = std * jax.random.normal(k3, (HIDDEN_DIM, OUT_DIM), jnp.float32)
    b2 = std * jax.random.normal(k6, (1, OUT_DIM), jnp.float32)
    mask_flat = jnp.triu(jnp.ones((OUTPUT_ROWS, OUTPUT_COLS), jnp.float32)
                         ).reshape(1, OUT_DIM)
    return (w1, b1, wh, bh, w2, b2, mask_flat)


def prepare_kernel_params(raw_params):
    """Fold the triu mask into fc2 and zero-pad the hidden width to 128 lanes."""
    w1, b1, wh, bh, w2, b2, mask_flat = raw_params
    ph = HID_PAD - HIDDEN_DIM
    w1p = jnp.pad(w1, ((0, 0), (0, ph)))                      # (IN, 128)
    whp = jnp.pad(wh, ((0, 0), (0, ph), (0, ph)))             # (L, 128, 128)
    w2m = jnp.pad(w2 * mask_flat, ((0, ph), (0, 0)))          # (128, 64), mask folded
    b1p = jnp.pad(b1, ((0, 0), (0, ph)))                      # (1, 128)
    bhp = jnp.pad(bh, ((0, 0), (0, 0), (0, ph)))              # (L, 1, 128)
    bias_h = jnp.concatenate([b1p[None], bhp], axis=0)        # (L+1, 1, 128)
    b2m = b2 * mask_flat                                      # (1, 64), mask folded
    return (w1p, whp, w2m, bias_h, b2m)


def _reference_forward(x, raw_params):
    """Pure-JAX reference mirroring the PyTorch forward (unfolded params)."""
    w1, b1, wh, bh, w2, b2, mask_flat = raw_params
    h = jax.nn.relu(x @ w1 + b1)
    for l in range(N_HIDDEN_LAYERS):
        h = jax.nn.relu(h @ wh[l] + bh[l])
    out = (h @ w2 + b2) * mask_flat
    return out.reshape(-1, OUTPUT_ROWS, OUTPUT_COLS)


if __name__ == "__main__":
    key = jax.random.PRNGKey(0)
    kx, kp = jax.random.split(key)
    x = jax.random.normal(kx, (BATCH, INPUT_DIM), jnp.float32)
    raw_params = init_params(kp)
    kernel_params = prepare_kernel_params(raw_params)

    out = cholesky_matrix_predictor(x, kernel_params)
    out = jax.block_until_ready(out)

    ref = _reference_forward(x, raw_params)
    assert out.shape == (BATCH, OUTPUT_ROWS, OUTPUT_COLS)
    assert jnp.allclose(out, ref, atol=1e-5, rtol=1e-5)
    print("KERNEL_OK")
</pallas_src>

<mosaic_0001>
module attributes {stable_mosaic.version = 11 : i64} {
  func.func @_mlp_cholesky_kernel(%arg0: i32, %arg1: memref<8x32xf32, #tpu.memory_space<vmem>>, %arg2: memref<32x128xf32, #tpu.memory_space<vmem>>, %arg3: memref<1x128x128xf32, #tpu.memory_space<vmem>>, %arg4: memref<128x64xf32, #tpu.memory_space<vmem>>, %arg5: memref<2x1x128xf32, #tpu.memory_space<vmem>>, %arg6: memref<1x64xf32, #tpu.memory_space<vmem>>, %arg7: memref<8x64xf32, #tpu.memory_space<vmem>>) attributes {dimension_semantics = [#tpu.dimension_semantics<parallel>], iteration_bounds = array<i64: 1>, scalar_prefetch = 0 : i64, scratch_operands = 0 : i64, tpu.core_type = #tpu.core_type<tc>, window_params = [{transform_indices = @transform_0, window_bounds = array<i64: 8, 32>}, {pipeline_mode = #tpu.pipeline_mode<synchronous>, transform_indices = @transform_1, window_bounds = array<i64: 32, 128>}, {pipeline_mode = #tpu.pipeline_mode<synchronous>, transform_indices = @transform_2, window_bounds = array<i64: 1, 128, 128>}, {pipeline_mode = #tpu.pipeline_mode<synchronous>, transform_indices = @transform_3, window_bounds = array<i64: 128, 64>}, {pipeline_mode = #tpu.pipeline_mode<synchronous>, transform_indices = @transform_4, window_bounds = array<i64: 2, 1, 128>}, {pipeline_mode = #tpu.pipeline_mode<synchronous>, transform_indices = @transform_5, window_bounds = array<i64: 1, 64>}, {transform_indices = @transform_6, window_bounds = array<i64: 8, 64>}]} {
    %c0 = arith.constant 0 : index
    %c0_0 = arith.constant 0 : index
    %0 = vector.load %arg1[%c0, %c0_0] : memref<8x32xf32, #tpu.memory_space<vmem>>, vector<8x32xf32>
    %c0_1 = arith.constant 0 : index
    %c0_2 = arith.constant 0 : index
    %1 = vector.load %arg2[%c0_1, %c0_2] : memref<32x128xf32, #tpu.memory_space<vmem>>, vector<32x128xf32>
    %cst = arith.constant dense<0.000000e+00> : vector<8x128xf32>
    %2 = tpu.matmul %0, %1, %cst {dimension_numbers = #tpu.dot_dimension_numbers<[1], [0], [0], [1], [0, 0, 1, 1], [], []>} : vector<8x32xf32>, vector<32x128xf32>, vector<8x128xf32> -> vector<8x128xf32>
    %c0_3 = arith.constant 0 : index
    %c0_4 = arith.constant 0 : index
    %c0_5 = arith.constant 0 : index
    %3 = vector.load %arg5[%c0_3, %c0_4, %c0_5] : memref<2x1x128xf32, #tpu.memory_space<vmem>>, vector<1x1x128xf32>
    %4 = vector.shape_cast %3 : vector<1x1x128xf32> to vector<1x128xf32>
    %5 = vector.broadcast %4 : vector<1x128xf32> to vector<8x128xf32>
    %6 = arith.addf %2, %5 : vector<8x128xf32>
    %cst_6 = arith.constant 0.000000e+00 : f32
    %7 = vector.broadcast %cst_6 : f32 to vector<8x128xf32>
    %8 = arith.maximumf %6, %7 : vector<8x128xf32>
    %c0_7 = arith.constant 0 : index
    %c0_8 = arith.constant 0 : index
    %c0_9 = arith.constant 0 : index
    %9 = vector.load %arg3[%c0_7, %c0_8, %c0_9] : memref<1x128x128xf32, #tpu.memory_space<vmem>>, vector<1x128x128xf32>
    %10 = vector.shape_cast %9 : vector<1x128x128xf32> to vector<128x128xf32>
    %cst_10 = arith.constant dense<0.000000e+00> : vector<8x128xf32>
    %11 = tpu.matmul %8, %10, %cst_10 {dimension_numbers = #tpu.dot_dimension_numbers<[1], [0], [0], [1], [0, 0, 1, 1], [], []>} : vector<8x128xf32>, vector<128x128xf32>, vector<8x128xf32> -> vector<8x128xf32>
    %c1 = arith.constant 1 : index
    %c0_11 = arith.constant 0 : index
    %c0_12 = arith.constant 0 : index
    %12 = vector.load %arg5[%c1, %c0_11, %c0_12] : memref<2x1x128xf32, #tpu.memory_space<vmem>>, vector<1x1x128xf32>
    %13 = vector.shape_cast %12 : vector<1x1x128xf32> to vector<1x128xf32>
    %14 = vector.broadcast %13 : vector<1x128xf32> to vector<8x128xf32>
    %15 = arith.addf %11, %14 : vector<8x128xf32>
    %cst_13 = arith.constant 0.000000e+00 : f32
    %16 = vector.broadcast %cst_13 : f32 to vector<8x128xf32>
    %17 = arith.maximumf %15, %16 : vector<8x128xf32>
    %c0_14 = arith.constant 0 : index
    %c0_15 = arith.constant 0 : index
    %18 = vector.load %arg4[%c0_14, %c0_15] : memref<128x64xf32, #tpu.memory_space<vmem>>, vector<128x64xf32>
    %cst_16 = arith.constant dense<0.000000e+00> : vector<8x64xf32>
    %19 = tpu.matmul %17, %18, %cst_16 {dimension_numbers = #tpu.dot_dimension_numbers<[1], [0], [0], [1], [0, 0, 1, 1], [], []>} : vector<8x128xf32>, vector<128x64xf32>, vector<8x64xf32> -> vector<8x64xf32>
    %c0_17 = arith.constant 0 : index
    %c0_18 = arith.constant 0 : index
    %20 = vector.load %arg6[%c0_17, %c0_18] : memref<1x64xf32, #tpu.memory_space<vmem>>, vector<1x64xf32>
    %21 = vector.broadcast %20 : vector<1x64xf32> to vector<8x64xf32>
    %22 = arith.addf %19, %21 : vector<8x64xf32>
    %c0_19 = arith.constant 0 : index
    %c0_20 = arith.constant 0 : index
    %23 = vector.load %arg7[%c0_19, %c0_20] : memref<8x64xf32, #tpu.memory_space<vmem>>, vector<8x64xf32>
    tpu.vector_store %arg7[%c0_19, %c0_20], %22 {strides = array<i32>} : memref<8x64xf32, #tpu.memory_space<vmem>>, vector<8x64xf32>,
    return
  }
  func.func @transform_0(%arg0: i32) -> (i32, i32) {
    %c0_i32 = arith.constant 0 : i32
    %c0_i32_0 = arith.constant 0 : i32
    return %arg0, %c0_i32 : i32, i32
  }
  func.func @transform_1(%arg0: i32) -> (i32, i32) {
    %c0_i32 = arith.constant 0 : i32
    %c0_i32_0 = arith.constant 0 : i32
    %c0_i32_1 = arith.constant 0 : i32
    return %c0_i32, %c0_i32_0 : i32, i32
  }
  func.func @transform_2(%arg0: i32) -> (i32, i32, i32) {
    %c0_i32 = arith.constant 0 : i32
    %c0_i32_0 = arith.constant 0 : i32
    %c0_i32_1 = arith.constant 0 : i32
    %c0_i32_2 = arith.constant 0 : i32
    return %c0_i32, %c0_i32_0, %c0_i32_1 : i32, i32, i32
  }
  func.func @transform_3(%arg0: i32) -> (i32, i32) {
    %c0_i32 = arith.constant 0 : i32
    %c0_i32_0 = arith.constant 0 : i32
    %c0_i32_1 = arith.constant 0 : i32
    return %c0_i32, %c0_i32_0 : i32, i32
  }
  func.func @transform_4(%arg0: i32) -> (i32, i32, i32) {
    %c0_i32 = arith.constant 0 : i32
    %c0_i32_0 = arith.constant 0 : i32
    %c0_i32_1 = arith.constant 0 : i32
    %c0_i32_2 = arith.constant 0 : i32
    return %c0_i32, %c0_i32_0, %c0_i32_1 : i32, i32, i32
  }
  func.func @transform_5(%arg0: i32) -> (i32, i32) {
    %c0_i32 = arith.constant 0 : i32
    %c0_i32_0 = arith.constant 0 : i32
    %c0_i32_1 = arith.constant 0 : i32
    return %c0_i32, %c0_i32_0 : i32, i32
  }
  func.func @transform_6(%arg0: i32) -> (i32, i32) {
    %c0_i32 = arith.constant 0 : i32
    %c0_i32_0 = arith.constant 0 : i32
    return %arg0, %c0_i32 : i32, i32
  }
}

</mosaic_0001>

<bundles_post_ra>
// kernel: tpu_custom_call.1
= control target key start
LH: loop header
LB: loop body
LE: loop exit
PB: predicated region body
PF: predicated region fallthrough
CT: control target
= control target key end

     0   :  { %vm33_vm0 = vcmask 261120   ;;  %s349_s0 = inlined_call_operand.vmem [shape: f32[8,32], index: 0, kind: input, shape index: {}]   ;;  %s350_s1 = inlined_call_operand.vmem [shape: f32[32,128], index: 1, kind: input, shape index: {}]   ;;  %s351_s2 = inlined_call_operand.vmem [shape: f32[1,128,128], index: 2, kind: input, shape index: {}]   ;;  %s352_s3 = inlined_call_operand.vmem [shape: f32[128,64], index: 3, kind: input, shape index: {}]   ;;  %s353_s4 = inlined_call_operand.vmem [shape: f32[2,1,128], index: 4, kind: input, shape index: {}]   ;;  %s354_s5 = inlined_call_operand.vmem [shape: f32[1,64], index: 5, kind: input, shape index: {}]   ;;  %s355_s6 = inlined_call_operand.hbm [shape: f32[8,64], index: 6, kind: output, shape index: {}]  }
   0x1   :  { %v28_v0 = vld [vmem:[%s350_s1 + $0x18] sm:$0xff]  ;;  %v27_v1 = vld [vmem:[%s350_s1 + $0x10] sm:$0xff]  ;;  %v26_v3 = vld [vmem:[%s350_s1 + $0x8] sm:$0xff] }
   0x2   :  { %49 = vmatpush.msra.mxu0 %v28_v0  ;;  %v73_v2 = vld [vmem:[%s351_s2 + $0x78] sm:$0xff]  ;;  %v72_v4 = vld [vmem:[%s351_s2 + $0x70] sm:$0xff]  ;;  %v71_v5 = vld [vmem:[%s351_s2 + $0x68] sm:$0xff] }
   0x3   :  { %79 = vmatpush.msra.mxu1 %v73_v2  ;;  %v25_v6 = vld [vmem:[%s350_s1] sm:$0xff]  ;;  %v69_v9 = vld [vmem:[%s351_s2 + $0x58] sm:$0xff] }
   0x4   :  { %50 = vmatpush.msra.mxu0 %v27_v1  ;;  %v24_v7 = vld [vmem:[%s349_s0] sm:$0xff] }
   0x5   :  { %80 = vmatpush.msra.mxu1 %v72_v4  ;;  %v70_v8 = vld [vmem:[%s351_s2 + $0x60] sm:$0xff] }
   0x6   :  { %51 = vmatpush.msra.mxu0 %v26_v3 }
   0x7   :  { %81 = vmatpush.msra.mxu1 %v71_v5 }
   0x8   :  { %52 = vmatpush.msra.mxu0 %v25_v6 }
   0x9   :  { %11 = vsyncpa [#allocation3], 0  ;;  %158 = vmatmul.msk.f32.vlgmr.msra.gmra.mxu0 %vm33_vm0, %v24_v7  ;;  %82 = vmatpush.msra.mxu1 %v70_v8  ;;  %v68_v10 = vld [vmem:[%s351_s2 + $0x50] sm:$0xff]  ;;  %v67_v11 = vld [vmem:[%s351_s2 + $0x48] sm:$0xff]  ;;  %s190_s21 = smov [#allocation2]   ;;  %s149_s25 = sshll.u32 %s355_s6, 4  ;;  %s150_s25 = int_to_ptr.hbm [resolvable:$true] %s149_s25 }
   0xa   :  { %v66_v12 = vld [vmem:[%s351_s2 + $0x40] sm:$0xff]  ;;  %v65_v13 = vld [vmem:[%s351_s2 + $0x38] sm:$0xff]  ;;  %v64_v14 = vld [vmem:[%s351_s2 + $0x30] sm:$0xff]  ;;  %s147_s22 = sshll.u32 %s190_s21, 4  ;;  %vm140_vm1 = vcmask 523264   ;;  %s148_s22 = int_to_ptr.vmem [resolvable:$true] %s147_s22 }
   0xb   :  { %83 = vmatpush.msra.mxu1 %v69_v9  ;;  %v63_v15 = vld [vmem:[%s351_s2 + $0x28] sm:$0xff]  ;;  %v62_v16 = vld [vmem:[%s351_s2 + $0x20] sm:$0xff]  ;;  %v61_v17 = vld [vmem:[%s351_s2 + $0x18] sm:$0xff] }
   0xc   :  { %v60_v18 = vld [vmem:[%s351_s2 + $0x10] sm:$0xff]  ;;  %v59_v19 = vld [vmem:[%s351_s2 + $0x8] sm:$0xff]  ;;  %v58_v20 = vld [vmem:[%s351_s2] sm:$0xff] }
   0xd   :  { %84 = vmatpush.msra.mxu1 %v68_v10  ;;  %v115_v21 = vld [vmem:[%s352_s3 + $0x78] sm:$0xff]  ;;  %v114_v22 = vld [vmem:[%s352_s3 + $0x70] sm:$0xff]  ;;  %v113_v23 = vld [vmem:[%s352_s3 + $0x68] sm:$0xff] }
   0xe   :  { %120 = vmatpush.msra.mxu2 %v115_v21  ;;  %v112_v24 = vld [vmem:[%s352_s3 + $0x60] sm:$0xff]  ;;  %v111_v25 = vld [vmem:[%s352_s3 + $0x58] sm:$0xff]  ;;  %v110_v26 = vld [vmem:[%s352_s3 + $0x50] sm:$0xff] }
   0xf   :  { %85 = vmatpush.msra.mxu1 %v67_v11  ;;  %v109_v27 = vld [vmem:[%s352_s3 + $0x48] sm:$0xff]  ;;  %v108_v28 = vld [vmem:[%s352_s3 + $0x40] sm:$0xff]  ;;  %v107_v29 = vld [vmem:[%s352_s3 + $0x38] sm:$0xff] }
  0x10   :  { %121 = vmatpush.msra.mxu2 %v114_v22  ;;  %v106_v30 = vld [vmem:[%s352_s3 + $0x30] sm:$0xff]  ;;  %v105_v31 = vld [vmem:[%s352_s3 + $0x28] sm:$0xff]  ;;  %v104_v32 = vld [vmem:[%s352_s3 + $0x20] sm:$0xff] }
  0x11   :  { %86 = vmatpush.msra.mxu1 %v66_v12  ;;  %v103_v33 = vld [vmem:[%s352_s3 + $0x18] sm:$0xff]  ;;  %v161_v34 = vld [vmem:[%s353_s4] ss:$0 sm:$0xff]  ;;  %v102_v38 = vld [vmem:[%s352_s3 + $0x10] sm:$0xff] }
  0x12   :  { %122 = vmatpush.msra.mxu2 %v113_v23  ;;  %v101_v39 = vld [vmem:[%s352_s3 + $0x8] sm:$0xff]  ;;  %v100_v40 = vld [vmem:[%s352_s3] sm:$0xff] }
  0x13   :  { %87 = vmatpush.msra.mxu1 %v65_v13  ;;  %v162_v41 = vld [vmem:[%s353_s4 + $0x1] ss:$0 sm:$0xff]  ;;  %v163_v45 = vld [vmem:[%s354_s5] ss:$0 sm:$0xff] }
  0x14   :  { %123 = vmatpush.msra.mxu2 %v112_v24 }
  0x15   :  { %88 = vmatpush.msra.mxu1 %v64_v14 }
  0x16   :  { %124 = vmatpush.msra.mxu2 %v111_v25 }
  0x17   :  { %89 = vmatpush.msra.mxu1 %v63_v15 }
  0x18   :  { %125 = vmatpush.msra.mxu2 %v110_v26 }
  0x19   :  { %90 = vmatpush.msra.mxu1 %v62_v16 }
  0x1a   :  { %126 = vmatpush.msra.mxu2 %v109_v27 }
  0x1b   :  { %91 = vmatpush.msra.mxu1 %v61_v17 }
  0x1c   :  { %127 = vmatpush.msra.mxu2 %v108_v28 }
  0x1d   :  { %92 = vmatpush.msra.mxu1 %v60_v18 }
  0x1e   :  { %128 = vmatpush.msra.mxu2 %v107_v29 }
  0x1f   :  { %93 = vmatpush.msra.mxu1 %v59_v19 }
  0x20   :  { %129 = vmatpush.msra.mxu2 %v106_v30 }
  0x21   :  { %94 = vmatpush.msra.mxu1 %v58_v20 }
  0x22   :  { %130 = vmatpush.msra.mxu2 %v105_v31 }
  0x24   :  { %131 = vmatpush.msra.mxu2 %v104_v32 }
  0x26   :  { %132 = vmatpush.msra.mxu2 %v103_v33 }
  0x28   :  { %133 = vmatpush.msra.mxu2 %v102_v38 }
  0x2a   :  { %134 = vmatpush.msra.mxu2 %v101_v39 }
  0x2c   :  { %135 = vmatpush.msra.mxu2 %v100_v40 }
  0x86   :  { %v54_v35 = vpop.f32.mrf.mxu0 }
  0x87   :  { %v55_v36 = vadd.f32 %v161_v34, %v54_v35 }
  0x89   :  { %v57_v37 = vmax.f32 %v55_v36, 0.0 }
  0x8b   :  { %95 = vmatmul.f32.vlgmr.msra.gmra.mxu1 %v57_v37 }
 0x108   :  { %v96_v42 = vpop.f32.mrf.mxu1 }
 0x109   :  { %v97_v43 = vadd.f32 %v162_v41, %v96_v42 }
 0x10b   :  { %v99_v44 = vmax.f32 %v97_v43, 0.0 }
 0x10d   :  { %136 = vmatmul.f32.vlgmr.msra.gmra.mxu2 %v99_v44 }
 0x190   :  { %v137_v46 = vpop.f32.mrf.mxu2 }
 0x191   :  { %v138_v47 = vadd.f32 %v163_v45, %v137_v46 }
 0x193   :  { %141 = vst.msk [vmem:[#allocation2] sm:$0xff] %vm140_vm1, %v138_v47 }
 0x194   :  { %152 = dma.vmem_to_hbm [thread:$0]  %s148_s22, 128, %s150_s25, [#allocation3]  }
 0x195   :  { %188 = dma.done.wait [#allocation3], 128  }
 0x196   :  { %189 = vsyncadd [#allocation3], 4294967168 }
 0x197   :  { %157 = vsyncpa [#allocation3], 1 }

</bundles_post_ra>
